<compile_context>
chip_gen: v7x
topology: tpu7x:2x2x1
jax: 0.10.0
libtpu: 0.0.40
codegen_flags: <defaults>
</compile_context>

<pallas_src>
import functools

import jax
import jax.numpy as jnp
from jax.experimental import pallas as pl
from jax.experimental.pallas import tpu as pltpu

EPS = 1e-5   # PyTorch BatchNorm1d default
LANE = 128


def _round_up(n, m):
    return ((n + m - 1) // m) * m


def _stroke_kernel(x_ref, w_ref, b_ref, o_ref, *, d, off2, off3):
    """One batch tile: x (tb, D) -> o (1, tb).  BN folded; dropout = identity (eval)."""
    x = x_ref[...]                                   # (tb, D) bf16

    w1 = w_ref[0:d, :]                               # (D, 128) bf16 (cols >= 64 are zero)
    w2 = w_ref[off2:off2 + LANE, :]                  # (128, 128) bf16
    w3 = w_ref[off3:off3 + 1, :]                     # (1, 128) bf16
    b1 = b_ref[0:1, :]                               # (1, 128) f32
    b2 = b_ref[1:2, :]                               # (1, 128) f32
    b3 = b_ref[2:3, 0:1]                             # (1, 1)   f32

    # Linear(D, 64) [BatchNorm1d(64) folded], out-dim zero-padded to 128 -> ReLU
    h1 = jnp.dot(x, w1, preferred_element_type=jnp.float32) + b1
    h1 = jnp.maximum(h1, 0.0)
    # ActivationDropout(p=0.2, rate=0.45, momentum=0.2): identity at inference.

    # Linear(64, 32) [BatchNorm1d(32) folded], padded to 128x128 -> ReLU
    h2 = jnp.dot(h1.astype(w2.dtype), w2, preferred_element_type=jnp.float32) + b2
    h2 = jnp.maximum(h2, 0.0)
    # ActivationDropout(p=0.3, rate=0.45, momentum=0.1): identity at inference.

    # Linear(32, 1) as (1,128) x (tb,128)^T -> (1, tb): lane-dense output row.
    # K is padded to 128 so the transposed-RHS contraction is the clean MXU case.
    out_row = jax.lax.dot_general(
        w3, h2.astype(w3.dtype), (((1,), (1,)), ((), ())),
        preferred_element_type=jnp.float32) + b3
    o_ref[...] = out_row.astype(o_ref.dtype)         # (1, tb)


def _fold_bn(w, b, gamma, beta, mean, var, eps=EPS):
    """Fold eval-mode BatchNorm1d into the preceding Linear (stored as (in, out))."""
    scale = gamma * jax.lax.rsqrt(var + eps)          # (1, out)
    return w * scale, (b - mean) * scale + beta


def _pack_params(w1f, b1f, w2f, b2f, w3, b3, d):
    """Pack all weights into one bf16 slab and all biases into one f32 slab.

    Weight slab rows: [0, d) = W1, [off2, off2+128) = W2, off3 = W3 row.
    Offsets are 16-aligned (bf16 native sublane tile); unset entries are the zero padding
    that makes h1/h2 lane-dense.
    """
    off2 = _round_up(d, 16)
    off3 = off2 + LANE
    rows = _round_up(off3 + 1, 16)
    wp = jnp.zeros((rows, LANE), jnp.bfloat16)
    wp = wp.at[:d, :w1f.shape[1]].set(w1f.astype(jnp.bfloat16))
    wp = wp.at[off2:off2 + w2f.shape[0], :w2f.shape[1]].set(w2f.astype(jnp.bfloat16))
    wp = wp.at[off3, :w3.shape[0]].set(w3[:, 0].astype(jnp.bfloat16))
    bp = jnp.zeros((8, LANE), jnp.float32)
    bp = bp.at[0, :b1f.shape[1]].set(b1f[0])
    bp = bp.at[1, :b2f.shape[1]].set(b2f[0])
    bp = bp.at[2, 0].set(b3[0, 0])
    return wp, bp, off2, off3


def _vmem_capacity_bytes():
    """Physical VMEM of the local chip (64 MiB v7x, 128 MiB v4/v5e/v6e)."""
    try:
        info_fn = getattr(pltpu, "get_tpu_info", None)
        if info_fn is not None:
            cap = getattr(info_fn(), "vmem_capacity_bytes", None)
            if cap:
                return int(cap)
    except Exception:
        pass
    return 64 << 20   # conservative fallback (v7x per-TensorCore)


@functools.partial(jax.jit, static_argnames=("tb",))
def stroke_model_forward(x, params, *, tb=None):
    """x: (B, D) float.  Returns (B,) float32 (matches torch's .squeeze(1))."""
    B, D = x.shape
    (w1, b1, g1, be1, m1, v1,
     w2, b2, g2, be2, m2, v2,
     w3, b3) = params

    # Fold BatchNorm (eval mode) into the Linear layers; pack + zero-pad params.
    w1f, b1f = _fold_bn(w1, b1, g1, be1, m1, v1)
    w2f, b2f = _fold_bn(w2, b2, g2, be2, m2, v2)
    wpack, bpack, off2, off3 = _pack_params(w1f, b1f, w2f, b2f, w3, b3, D)

    # bf16 activations halve the dominant HBM stream (f32 accumulation in the MXU).
    # If callers keep x in bf16 upstream, this convert disappears entirely.
    if x.dtype != jnp.bfloat16:
        x = x.astype(jnp.bfloat16)

    # ---- generation-aware VMEM budget & batch-tile size --------------------------------
    vmem_cap = _vmem_capacity_bytes()
    vmem_limit = int(min((vmem_cap * 3) // 4, 100 << 20))    # ~48 MiB v7x, ~96 MiB v5e/v6e

    # Per-row VMEM footprint with (8/16,128) lane padding: double-buffered bf16 x tile
    # (D padded to 128 lanes), h1/h2 f32 intermediates + their bf16 casts, output row.
    per_row = (2 * _round_up(D, LANE) * 2            # x tile, double-buffered, bf16
               + 2 * (LANE * 4 + LANE * 2)           # h1/h2 f32 + bf16 casts
               + 64)                                 # output row slab
    per_row = int(per_row * 1.25) + 8                # compiler-scratch slack
    budget = max(vmem_limit - (2 << 20), 8 << 20)    # headroom for params/internal scratch
    tb_cap = max(LANE, min((budget // per_row) // LANE * LANE, 32768))

    tb_req = tb_cap if tb is None else max(LANE, _round_up(int(tb), LANE))
    tb_eff = min(tb_req, tb_cap)

    # Clamp by the (128-rounded) batch, and keep >= 2 tiles whenever possible so v7x's
    # two TensorCores both get work on the "parallel" axis (no-op on 1-TC v5e/v6e).
    b_ceil = _round_up(B, LANE)
    tb_eff = min(tb_eff, b_ceil)
    if b_ceil >= 2 * LANE:
        tb_eff = min(tb_eff, _round_up(-(-b_ceil // 2), LANE))
    tb_eff = max(LANE, (tb_eff // LANE) * LANE)

    # No jnp.pad of x: trailing partial block reads only the valid rows; the stale tail
    # rows produce garbage lanes that Pallas masks on the (1, B) output write.
    num_tiles = -(-B // tb_eff)

    param_bytes = wpack.size * 2 + bpack.size * 4
    flops = 2 * B * (D * LANE + LANE * LANE + LANE)
    bytes_accessed = int(B * D * x.dtype.itemsize + B * 4 + param_bytes)

    kernel = functools.partial(_stroke_kernel, d=D, off2=off2, off3=off3)
    full = lambda a: pl.BlockSpec(a.shape, lambda i: (0,) * a.ndim)

    out = pl.pallas_call(
        kernel,
        out_shape=jax.ShapeDtypeStruct((1, B), jnp.float32),
        grid=(num_tiles,),
        in_specs=[
            pl.BlockSpec((tb_eff, D), lambda i: (i, 0)),   # x: tiled over batch
            full(wpack), full(bpack),                      # packed params, constant index
        ],
        out_specs=pl.BlockSpec((1, tb_eff), lambda i: (0, i)),   # lane-dense output row
        compiler_params=pltpu.CompilerParams(
            dimension_semantics=("parallel",),
            vmem_limit_bytes=vmem_limit,
        ),
        cost_estimate=pl.CostEstimate(
            flops=flops, transcendentals=0, bytes_accessed=bytes_accessed),
    )(x, wpack, bpack)

    return out[0, :]                                   # (B,) — matches torch .squeeze(1)


def init_params(key, input_dim):
    """Deterministic synthetic parameters (shapes match the PyTorch module)."""
    ks = jax.random.split(key, 10)
    f32 = jnp.float32
    # Linear 1: (input_dim -> 64), stored as (in, out)
    w1 = jax.random.normal(ks[0], (input_dim, 64), f32) * 0.1
    b1 = jax.random.normal(ks[1], (1, 64), f32) * 0.1
    # BatchNorm1d(64) eval-mode params / running stats
    g1 = 1.0 + 0.1 * jax.random.normal(ks[2], (1, 64), f32)
    be1 = 0.1 * jax.random.normal(ks[3], (1, 64), f32)
    m1 = 0.1 * jax.random.normal(ks[4], (1, 64), f32)
    v1 = 1.0 + 0.1 * jax.random.uniform(ks[5], (1, 64), f32)
    # Linear 2: (64 -> 32)
    w2 = jax.random.normal(ks[6], (64, 32), f32) * 0.1
    b2 = jax.random.normal(ks[7], (1, 32), f32) * 0.1
    # BatchNorm1d(32)
    g2 = 1.0 + 0.1 * jax.random.normal(ks[8], (1, 32), f32)
    be2 = 0.1 * jax.random.normal(ks[9], (1, 32), f32)
    m2 = jnp.linspace(-0.1, 0.1, 32, dtype=f32).reshape(1, 32)
    v2 = 1.0 + jnp.linspace(0.0, 0.2, 32, dtype=f32).reshape(1, 32)
    # Linear 3: (32 -> 1)
    w3 = jnp.linspace(-0.2, 0.2, 32, dtype=f32).reshape(32, 1)
    b3 = jnp.full((1, 1), 0.05, f32)
    return (w1, b1, g1, be1, m1, v1,
            w2, b2, g2, be2, m2, v2,
            w3, b3)


def reference_forward(x, params):
    """Pure-JAX f32 reference with un-folded eval-mode BatchNorm (mirrors PyTorch)."""
    (w1, b1, g1, be1, m1, v1,
     w2, b2, g2, be2, m2, v2,
     w3, b3) = params
    h1 = x @ w1 + b1
    h1 = (h1 - m1) / jnp.sqrt(v1 + EPS) * g1 + be1
    h1 = jnp.maximum(h1, 0.0)
    h2 = h1 @ w2 + b2
    h2 = (h2 - m2) / jnp.sqrt(v2 + EPS) * g2 + be2
    h2 = jnp.maximum(h2, 0.0)
    return (h2 @ w3 + b3)[:, 0]


if __name__ == "__main__":
    key = jax.random.PRNGKey(0)
    k_x, k_p = jax.random.split(key)

    # Small demo shapes; B is deliberately NOT a tile multiple to exercise the masked
    # trailing partial block, and the >=2-tile rule gives a 2-step "parallel" grid.
    B, INPUT_DIM = 200, 16
    x = jax.random.normal(k_x, (B, INPUT_DIM), jnp.float32)
    params = init_params(k_p, INPUT_DIM)

    out = stroke_model_forward(x, params)
    out = jax.block_until_ready(out)

    ref = reference_forward(x, params)
    assert out.shape == (B,)
    # Tolerance relaxed vs. the f32 reference because activations/weights run in bf16.
    err = float(jnp.max(jnp.abs(out - ref)))
    assert jnp.allclose(out, ref, atol=3e-2, rtol=3e-2), ("max_abs_err", err)

    print("KERNEL_OK")
</pallas_src>

<mosaic_0001>
module attributes {stable_mosaic.version = 11 : i64} {
  func.func @_stroke_kernel(%arg0: i32, %arg1: memref<128x16xbf16, #tpu.memory_space<vmem>>, %arg2: memref<160x128xbf16, #tpu.memory_space<vmem>>, %arg3: memref<8x128xf32, #tpu.memory_space<vmem>>, %arg4: memref<1x128xf32, #tpu.memory_space<vmem>>) attributes {dimension_semantics = [#tpu.dimension_semantics<parallel>], iteration_bounds = array<i64: 2>, scalar_prefetch = 0 : i64, scratch_operands = 0 : i64, tpu.core_type = #tpu.core_type<tc>, window_params = [{transform_indices = @transform_0, window_bounds = array<i64: 128, 16>}, {pipeline_mode = #tpu.pipeline_mode<synchronous>, transform_indices = @transform_1, window_bounds = array<i64: 160, 128>}, {pipeline_mode = #tpu.pipeline_mode<synchronous>, transform_indices = @transform_2, window_bounds = array<i64: 8, 128>}, {transform_indices = @transform_3, window_bounds = array<i64: 1, 128>}]} {
    %c0 = arith.constant 0 : index
    %c0_0 = arith.constant 0 : index
    %0 = vector.load %arg1[%c0, %c0_0] : memref<128x16xbf16, #tpu.memory_space<vmem>>, vector<128x16xbf16>
    %c0_1 = arith.constant 0 : index
    %c0_2 = arith.constant 0 : index
    %1 = vector.load %arg2[%c0_1, %c0_2] : memref<160x128xbf16, #tpu.memory_space<vmem>>, vector<16x128xbf16>
    %c16 = arith.constant 16 : index
    %c0_3 = arith.constant 0 : index
    %2 = vector.load %arg2[%c16, %c0_3] : memref<160x128xbf16, #tpu.memory_space<vmem>>, vector<128x128xbf16>
    %c144 = arith.constant 144 : index
    %c0_4 = arith.constant 0 : index
    %3 = vector.load %arg2[%c144, %c0_4] : memref<160x128xbf16, #tpu.memory_space<vmem>>, vector<1x128xbf16>
    %c0_5 = arith.constant 0 : index
    %c0_6 = arith.constant 0 : index
    %4 = vector.load %arg3[%c0_5, %c0_6] : memref<8x128xf32, #tpu.memory_space<vmem>>, vector<1x128xf32>
    %c1 = arith.constant 1 : index
    %c0_7 = arith.constant 0 : index
    %5 = vector.load %arg3[%c1, %c0_7] : memref<8x128xf32, #tpu.memory_space<vmem>>, vector<1x128xf32>
    %c2 = arith.constant 2 : index
    %c0_8 = arith.constant 0 : index
    %6 = vector.load %arg3[%c2, %c0_8] : memref<8x128xf32, #tpu.memory_space<vmem>>, vector<1x1xf32>
    %cst = arith.constant dense<0.000000e+00> : vector<128x128xf32>
    %7 = tpu.matmul %0, %1, %cst {dimension_numbers = #tpu.dot_dimension_numbers<[1], [0], [0], [1], [0, 0, 1, 1], [], []>} : vector<128x16xbf16>, vector<16x128xbf16>, vector<128x128xf32> -> vector<128x128xf32>
    %8 = vector.broadcast %4 : vector<1x128xf32> to vector<128x128xf32>
    %9 = arith.addf %7, %8 : vector<128x128xf32>
    %cst_9 = arith.constant 0.000000e+00 : f32
    %10 = vector.broadcast %cst_9 : f32 to vector<128x128xf32>
    %11 = arith.maximumf %9, %10 : vector<128x128xf32>
    %12 = arith.truncf %11 : vector<128x128xf32> to vector<128x128xbf16>
    %cst_10 = arith.constant dense<0.000000e+00> : vector<128x128xf32>
    %13 = tpu.matmul %12, %2, %cst_10 {dimension_numbers = #tpu.dot_dimension_numbers<[1], [0], [0], [1], [0, 0, 1, 1], [], []>} : vector<128x128xbf16>, vector<128x128xbf16>, vector<128x128xf32> -> vector<128x128xf32>
    %14 = vector.broadcast %5 : vector<1x128xf32> to vector<128x128xf32>
    %15 = arith.addf %13, %14 : vector<128x128xf32>
    %cst_11 = arith.constant 0.000000e+00 : f32
    %16 = vector.broadcast %cst_11 : f32 to vector<128x128xf32>
    %17 = arith.maximumf %15, %16 : vector<128x128xf32>
    %18 = arith.truncf %17 : vector<128x128xf32> to vector<128x128xbf16>
    %cst_12 = arith.constant dense<0.000000e+00> : vector<1x128xf32>
    %19 = tpu.matmul %3, %18, %cst_12 {dimension_numbers = #tpu.dot_dimension_numbers<[1], [1], [0], [0], [0, 0, 1, 0], [], []>} : vector<1x128xbf16>, vector<128x128xbf16>, vector<1x128xf32> -> vector<1x128xf32>
    %20 = vector.broadcast %6 : vector<1x1xf32> to vector<1x128xf32>
    %21 = arith.addf %19, %20 : vector<1x128xf32>
    %c0_13 = arith.constant 0 : index
    %c0_14 = arith.constant 0 : index
    %22 = vector.load %arg4[%c0_13, %c0_14] : memref<1x128xf32, #tpu.memory_space<vmem>>, vector<1x128xf32>
    tpu.vector_store %arg4[%c0_13, %c0_14], %21 {strides = array<i32>} : memref<1x128xf32, #tpu.memory_space<vmem>>, vector<1x128xf32>,
    return
  }
  func.func @transform_0(%arg0: i32) -> (i32, i32) {
    %c0_i32 = arith.constant 0 : i32
    %c0_i32_0 = arith.constant 0 : i32
    return %arg0, %c0_i32 : i32, i32
  }
  func.func @transform_1(%arg0: i32) -> (i32, i32) {
    %c0_i32 = arith.constant 0 : i32
    %c0_i32_0 = arith.constant 0 : i32
    %c0_i32_1 = arith.constant 0 : i32
    return %c0_i32, %c0_i32_0 : i32, i32
  }
  func.func @transform_2(%arg0: i32) -> (i32, i32) {
    %c0_i32 = arith.constant 0 : i32
    %c0_i32_0 = arith.constant 0 : i32
    %c0_i32_1 = arith.constant 0 : i32
    return %c0_i32, %c0_i32_0 : i32, i32
  }
  func.func @transform_3(%arg0: i32) -> (i32, i32) {
    %c0_i32 = arith.constant 0 : i32
    %c0_i32_0 = arith.constant 0 : i32
    return %c0_i32, %arg0 : i32, i32
  }
}

</mosaic_0001>

<bundles_post_ra>
// kernel: stroke_model_forward.1
= control target key start
LH: loop header
LB: loop body
LE: loop exit
PB: predicated region body
PF: predicated region fallthrough
CT: control target
= control target key end

     0   :  { %8 = vsyncpa [#allocation3], 0  ;;  %s1165_s0 = inlined_call_operand.vmem [shape: bf16[200,16], index: 0, kind: input, shape index: {}]   ;;  %s1166_s1 = inlined_call_operand.vmem [shape: bf16[160,128], index: 1, kind: input, shape index: {}]   ;;  %s1167_s2 = inlined_call_operand.vmem [shape: f32[8,128], index: 2, kind: input, shape index: {}]   ;;  %s1168_s3 = inlined_call_operand.hbm [shape: f32[1,200], index: 3, kind: output, shape index: {}]  }
   0x1   :  { %10 = vsyncpa [#allocation3 + $0x1], 0  ;;  %s1000_s12 = smov 0   ;;  %s1002_s13 = smov 0  }
   0x2   :  { %s1004_s14 = smov 0   ;;  %s1006_s15 = smov 0  }
   0x3 LB: > { %s711_s16 = sadd.s32 4294967295, %s974_s15   ;;  %s712_s17 = sadd.s32 4294967294, %s974_s15   ;;  %s974_s15 = sphi %s1006_s15, %s1174_s15   ;;  %s970_s14 = sphi %s1004_s14, %s1173_s14   ;;  %s966_s13 = sphi %s1002_s13, %s1172_s13   ;;  %s962_s12 = sphi %s1000_s12, %s1171_s12  }
   0x4   : > { %s1023_s18 = sadd.s32 1, %s974_s15   ;;  %s91_s19 = sadd.s32 1, %s970_s14 }
   0x5   : > { %s88_s20 = ssub.s32 %s974_s15, %s1023_s18  ;;  %p101_p0 = scmp.ne.s32.totalorder %s970_s14, %s966_s13 }
   0x6   : > { %p89_p1 = scmp.eq.s32.totalorder %s88_s20, 0  ;;  %p102_p2 = scmp.eq.s32.totalorder %s711_s16, 1 }
   0x7   : > { %p107_p3 = scmp.ne.s32.totalorder %s966_s13, %s962_s12  ;;  %p108_p4 = scmp.eq.s32.totalorder %s712_s17, 1 }
   0x8   : > { %s1033_s21 = scalar_select %p89_p1, %s970_s14, %s91_s19  }
   0x9   : > { %p1035_p5 = por %p102_p2, %p101_p0  ;;  %p1039_p6 = por %p108_p4, %p107_p3 }
   0xa   : > { %p715_p7 = scmp.ge.s32.totalorder %s974_s15, 1  ;;  %p149_p8 = scmp.lt.s32.totalorder %s974_s15, 3 }
   0xc   : > { %p150_p9 = pnand %p715_p7, %p149_p8 }
   0xd   : > { %v895_v0 = vld [vmem:[%s1166_s1] sm:$0xff] (!%p150_p9)   ;;  %s1048_s26 = sshll.u32 (!%p150_p9), %s711_s16, 4  ;;  %v904_v1 = vld [vmem:[%s1166_s1 + $0x8] sm:$0xff] (!%p150_p9)   ;;  %vm279_vm0 = vcmask (!%p150_p9), 130048   ;;  %v905_v2 = vld [vmem:[%s1166_s1 + $0x10] sm:$0xff] (!%p150_p9)   ;;  %vm977_vm1 = vmmov (!%p150_p9), 0  }
   0xe   : > { %153 = sbr.rel (%p150_p9) target bundleno = 761 (0x2f9), region = 32  ;;  %p181_p10 = scmp.lt.s32.totalorder (!%p150_p9), %s1048_s26, 24  ;;  %782 = vmatprep.subr.bf16.mxu1 (!%p150_p9), %v895_v0  ;;  %v906_v6 = vld [vmem:[%s1166_s1 + $0x18] sm:$0xff] (!%p150_p9)   ;;  %v907_v9 = vld [vmem:[%s1166_s1 + $0x20] sm:$0xff] (!%p150_p9)   ;;  %v908_v10 = vld [vmem:[%s1166_s1 + $0x28] sm:$0xff] (!%p150_p9)  }
   0xf   : > { %783 = vmatpush3.bf16.msra.mxu1 (!%p150_p9), %v895_v0  ;;  %v909_v13 = vld [vmem:[%s1166_s1 + $0x30] sm:$0xff] (!%p150_p9)   ;;  %v910_v15 = vld [vmem:[%s1166_s1 + $0x38] sm:$0xff] (!%p150_p9)   ;;  %v911_v16 = vld [vmem:[%s1166_s1 + $0x40] sm:$0xff] (!%p150_p9)   ;;  %s174_s11 = sand.u32 (!%p150_p9), 1, %s966_s13   ;;  %s1123_s24 = scalar_lea.hbm (!%p150_p9), %s1168_s3, %s1048_s26 }
  0x10   : > { %800 = vmatprep.subr.bf16.mxu1 (!%p150_p9), %v904_v1  ;;  %v718_v17 = vld [vmem:[%s1167_s2] ss:$0 sm:$0xff] (!%p150_p9)  ;;  %s175_s16 = scalar_lea.vmem (!%p150_p9), [#allocation2], %s174_s11  ;;  %s645_s25 = scalar_lea.sflag (!%p150_p9), [#allocation3], %s174_s11 }
  0x11   : > { %s657_s17 = sshll.u32 (!%p150_p9), %s175_s16, 4  ;;  %s979_s28 = smov (!%p150_p9), [#allocation2]   ;;  %s1125_s17 = int_to_ptr.vmem [resolvable:$true] %s657_s17 }
  0x12   : > { %s912_s27 = scalar_lea.vmem (!%p150_p9), %s1125_s17, 16 }
  0x13   : > { %p913_p11 = scmp.ne.s32.totalorder (!%p150_p9), %s1125_s17, %s912_s27 }
  0x15   : > { %s182_s29 = scalar_select %p181_p10, %s1048_s26, 24 }
  0x16   : > { %p914_p12 = pnand %p913_p11, %p1035_p5 }
  0x17   : > { %s717_s30 = sshll.u32 %s182_s29, 2  ;;  %s916_s29 = sshll.u32 %s979_s28, 4  ;;  %s917_s29 = int_to_ptr.vmem [resolvable:$false] %s916_s29 }
  0x18   : > { %s1058_s6 = scalar_lea.vmem %s1165_s0, %s717_s30  ;;  %p915_p13 = pneg %p914_p12 }
  0x19   : > { %v896_v3 = vld [vmem:[%s1058_s6] sm:$0xff]   ;;  %v897_v4 = vld [vmem:[%s1058_s6 + $0x8] sm:$0xff]   ;;  %v898_v5 = vld [vmem:[%s1058_s6 + $0x10] sm:$0xff]   ;;  %s918_s30 = scalar_lea.vmem %s917_s29, 32  ;;  %p919_p0 = scmp.lt.s32.totalorder %s1125_s17, %s917_s29 }
  0x1a   : > { %784 = vmatprep.mubr.msk.bf16.mxu1 %vm279_vm0, %v896_v3  ;;  %v899_v7 = vld [vmem:[%s1058_s6 + $0x18] sm:$0xff]   ;;  %v900_v8 = vld [vmem:[%s1058_s6 + $0x20] sm:$0xff]   ;;  %v901_v11 = vld [vmem:[%s1058_s6 + $0x28] sm:$0xff]   ;;  %p920_p1 = scmp.lt.s32.totalorder %s918_s30, %s912_s27 }
  0x1b   : > { %785 = vmatmul.mubr.msk.bf16.vlgmr.msra.gmra.mrb[0].mxu1 %vm279_vm0, %v897_v4  ;;  %v902_v12 = vld [vmem:[%s1058_s6 + $0x30] sm:$0xff]   ;;  %v903_v14 = vld [vmem:[%s1058_s6 + $0x38] sm:$0xff]  }
  0x1c   : > { %788 = vmatprep.mubr.msk.bf16.mxu1 %vm279_vm0, %v898_v5  ;;  %801 = vmatpush3.bf16.msra.mxu1 %v904_v1  ;;  %p921_p2 = por %p920_p1, %p919_p0 }
  0x1d   : > { %802 = vmatprep.subr.bf16.mxu1 %v905_v2 }
  0x1e   : > { %p922_p3 = pnand %p921_p2, %p915_p13 }
  0x20   : > { %803 = vmatpush3.bf16.msra.mxu1 %v905_v2 }
  0x21   : > { %804 = vmatprep.subr.bf16.mxu1 %v906_v6 }
  0x23   : > { %789 = vmatmul.mubr.msk.bf16.gmra.mrb[4].mxu1 %vm279_vm0, %v899_v7 }
  0x24   : > { %792 = vmatprep.mubr.msk.bf16.mxu1 %vm279_vm0, %v900_v8  ;;  %805 = vmatpush3.bf16.msra.mxu1 %v906_v6 }
  0x25   : > { %806 = vmatprep.subr.bf16.mxu1 %v907_v9 }
  0x28   : > { %807 = vmatpush3.bf16.msra.mxu1 %v907_v9 }
  0x29   : > { %808 = vmatprep.subr.bf16.mxu1 %v908_v10 }
  0x2b   : > { %793 = vmatmul.mubr.msk.bf16.gmra.mrb[8].mxu1 %vm279_vm0, %v901_v11  ;;  %v228_v11 = vld [vmem:[%s1167_s2 + $0x2] sm:$0x1] }
  0x2c   : > { %796 = vmatprep.mubr.msk.bf16.mxu1 %vm279_vm0, %v902_v12  ;;  %809 = vmatpush3.bf16.msra.mxu1 %v908_v10  ;;  %v976_v10 = vmov 0.0   ;;  %v978_v12 = vmov 0  }
  0x2d   : > { %810 = vmatprep.subr.bf16.mxu1 %v909_v13  ;;  %832 = vmatprep.subr.bf16.mxu0 %v976_v10 }
  0x2e   : > { %848 = vmatprep.mubr.msk.bf16.mxu0 %vm977_vm1, %v976_v10  ;;  %894 = vset.pattern.permute.xlu0 %v978_v12 }
  0x2f   : > { %600 = vperm.xlu0 %894, %v228_v11  }
  0x30   : > { %811 = vmatpush3.bf16.msra.mxu1 %v909_v13  ;;  %v736_v13 = vld [vmem:[%s1167_s2 + $0x1] ss:$0 sm:$0xff] }
  0x31   : > { %812 = vmatprep.subr.bf16.mxu1 %v910_v15 }
  0x33   : > { %797 = vmatmul.mubr.msk.bf16.gmra.mrb[12].mxu1 %vm279_vm0, %v903_v14 }
  0x34   : > { %813 = vmatpush3.bf16.msra.mxu1 %v910_v15 }
  0x35   : > { %814 = vmatprep.subr.bf16.mxu1 %v911_v16 }
  0x38   : > { %815 = vmatpush3.bf16.msra.mxu1 %v911_v16 }
  0xee   : > { %v786_v18 = vpop.f32.mrb[0].mxu1 }
  0xef   : > { %v347_v19 = vadd.f32 %v786_v18, %v718_v17  ;;  %v338_v20 = vpop.f32.mrb[1].mxu1 }
  0xf0   : > { %v339_v21 = vadd.f32 %v718_v17, %v338_v20  ;;  %v787_v22 = vpop.f32.mrb[2].mxu1 }
  0xf1   : > { %v350_v23 = vadd.f32 %v787_v22, %v718_v17  ;;  %v341_v24 = vpop.f32.mrb[3].mxu1  ;;  %v403_v26 = vmax.f32 %v347_v19, 0.0 }
  0xf2   : > { %v342_v25 = vadd.f32 %v718_v17, %v341_v24  ;;  %v401_v28 = vmax.f32 %v339_v21, 0.0 }
  0xf3   : > { %v404_v27 = vmax.f32 %v350_v23, 0.0 }
  0xf4   : > { %v402_v29 = vmax.f32 %v342_v25, 0.0 }
  0xf5   : > { %v418_v30 = vpack.c.bf16 %v404_v27, %v403_v26 }
  0xf6   : > { %v417_v31 = vpack.c.bf16 %v402_v29, %v401_v28  ;;  %v790_v32 = vpop.f32.mrb[4].mxu1 }
  0xf7   : > { %v363_v33 = vadd.f32 %v790_v32, %v718_v17  ;;  %v354_v34 = vpop.f32.mrb[5].mxu1 }
  0xf8   : > { %v355_v35 = vadd.f32 %v718_v17, %v354_v34  ;;  %816 = vmatprep.mubr.bf16.mxu1 %v417_v31  ;;  %v791_v36 = vpop.f32.mrb[6].mxu1 }
  0xf9   : > { %v407_v37 = vmax.f32 %v363_v33, 0.0  ;;  %v366_v38 = vadd.f32 %v791_v36, %v718_v17  ;;  %817 = vmatmul.mubr.bf16.vlgmr.msra.gmra.mrb[16].mxu1 %v418_v30  ;;  %v357_v39 = vpop.f32.mrb[7].mxu1 }
  0xfa   : > { %v405_v40 = vmax.f32 %v355_v35, 0.0  ;;  %v358_v41 = vadd.f32 %v718_v17, %v357_v39 }
  0xfb   : > { %v408_v42 = vmax.f32 %v366_v38, 0.0 }
  0xfc   : > { %v406_v43 = vmax.f32 %v358_v41, 0.0 }
  0xfd   : > { %v420_v44 = vpack.c.bf16 %v408_v42, %v407_v37 }
  0xfe   : > { %v419_v45 = vpack.c.bf16 %v406_v43, %v405_v40  ;;  %v794_v46 = vpop.f32.mrb[8].mxu1 }
  0xff   : > { %v379_v47 = vadd.f32 %v794_v46, %v718_v17  ;;  %v370_v48 = vpop.f32.mrb[9].mxu1 }
 0x100   : > { %820 = vmatprep.mubr.bf16.mxu1 %v419_v45  ;;  %v371_v49 = vadd.f32 %v718_v17, %v370_v48  ;;  %v795_v50 = vpop.f32.mrb[10].mxu1 }
 0x101   : > { %821 = vmatmul.mubr.bf16.gmra.mrb[20].mxu1 %v420_v44  ;;  %v411_v51 = vmax.f32 %v379_v47, 0.0  ;;  %v382_v52 = vadd.f32 %v795_v50, %v718_v17  ;;  %v373_v53 = vpop.f32.mrb[11].mxu1 }
 0x102   : > { %v409_v54 = vmax.f32 %v371_v49, 0.0  ;;  %v374_v55 = vadd.f32 %v718_v17, %v373_v53 }
 0x103   : > { %v412_v56 = vmax.f32 %v382_v52, 0.0 }
 0x104   : > { %v410_v57 = vmax.f32 %v374_v55, 0.0 }
 0x105   : > { %v422_v58 = vpack.c.bf16 %v412_v56, %v411_v51 }
 0x106   : > { %v421_v59 = vpack.c.bf16 %v410_v57, %v409_v54  ;;  %v798_v60 = vpop.f32.mrb[12].mxu1 }
 0x107   : > { %v395_v61 = vadd.f32 %v798_v60, %v718_v17  ;;  %v386_v62 = vpop.f32.mrb[13].mxu1 }
 0x108   : > { %824 = vmatprep.mubr.bf16.mxu1 %v421_v59  ;;  %v387_v63 = vadd.f32 %v718_v17, %v386_v62  ;;  %v799_v0 = vpop.f32.mrb[14].mxu1 }
 0x109   : > { %825 = vmatmul.mubr.bf16.gmra.mrb[24].mxu1 %v422_v58  ;;  %v415_v1 = vmax.f32 %v395_v61, 0.0  ;;  %v398_v2 = vadd.f32 %v799_v0, %v718_v17  ;;  %v389_v3 = vpop.f32.mrb[15].mxu1 }
 0x10a   : > { %v413_v4 = vmax.f32 %v387_v63, 0.0  ;;  %v390_v5 = vadd.f32 %v718_v17, %v389_v3 }
 0x10b   : > { %v416_v6 = vmax.f32 %v398_v2, 0.0 }
 0x10c   : > { %v414_v7 = vmax.f32 %v390_v5, 0.0 }
 0x10d   : > { %v424_v8 = vpack.c.bf16 %v416_v6, %v415_v1  ;;  %v225_v6 = vld [vmem:[%s1166_s1 + $0x48] sm:$0x1] }
 0x10e   : > { %v423_v9 = vpack.c.bf16 %v414_v7, %v413_v4  ;;  %v601_v7 = vpop.permute.xlu0 %600 }
 0x110   : > { %828 = vmatprep.mubr.bf16.mxu1 %v423_v9 }
 0x111   : > { %829 = vmatmul.mubr.bf16.gmra.mrb[28].mxu1 %v424_v8 }
 0x1cc   : > { %v818_v14 = vpop.f32.mrb[16].mxu1 }
 0x1cd   : > { %v520_v15 = vadd.f32 %v818_v14, %v736_v13  ;;  %v511_v16 = vpop.f32.mrb[17].mxu1 }
 0x1ce   : > { %v512_v17 = vadd.f32 %v736_v13, %v511_v16  ;;  %v819_v18 = vpop.f32.mrb[18].mxu1 }
 0x1cf   : > { %v523_v19 = vadd.f32 %v819_v18, %v736_v13  ;;  %v514_v20 = vpop.f32.mrb[19].mxu1  ;;  %v576_v22 = vmax.f32 %v520_v15, 0.0 }
 0x1d0   : > { %v515_v21 = vadd.f32 %v736_v13, %v514_v20  ;;  %v574_v24 = vmax.f32 %v512_v17, 0.0 }
 0x1d1   : > { %v577_v23 = vmax.f32 %v523_v19, 0.0 }
 0x1d2   : > { %v575_v25 = vmax.f32 %v515_v21, 0.0 }
 0x1d3   : > { %v591_v26 = vpack.c.bf16 %v577_v23, %v576_v22 }
 0x1d4   : > { %v822_v27 = vpop.f32.mrb[20].mxu1  ;;  %v590_v28 = vpack.c.bf16 %v575_v25, %v574_v24 }
 0x1d5   : > { %v536_v29 = vadd.f32 %v822_v27, %v736_v13  ;;  %v527_v30 = vpop.f32.mrb[21].mxu1 }
 0x1d6   : > { %v528_v31 = vadd.f32 %v736_v13, %v527_v30  ;;  %833 = vmatpush3.bf16.xpose.msra.mxu0 %v590_v28  ;;  %v823_v32 = vpop.f32.mrb[22].mxu1 }
 0x1d7   : > { %v580_v33 = vmax.f32 %v536_v29, 0.0  ;;  %v539_v34 = vadd.f32 %v823_v32, %v736_v13  ;;  %v530_v35 = vpop.f32.mrb[23].mxu1  ;;  %834 = vmatprep.subr.bf16.mxu0 %v976_v10 }
 0x1d8   : > { %v578_v36 = vmax.f32 %v528_v31, 0.0  ;;  %v531_v37 = vadd.f32 %v736_v13, %v530_v35 }
 0x1d9   : > { %v581_v38 = vmax.f32 %v539_v34, 0.0 }
 0x1da   : > { %v579_v39 = vmax.f32 %v531_v37, 0.0 }
 0x1db   : > { %v593_v40 = vpack.c.bf16 %v581_v38, %v580_v33 }
 0x1dc   : > { %v592_v41 = vpack.c.bf16 %v579_v39, %v578_v36  ;;  %v826_v42 = vpop.f32.mrb[24].mxu1 }
 0x1dd   : > { %v552_v43 = vadd.f32 %v826_v42, %v736_v13  ;;  %v543_v44 = vpop.f32.mrb[25].mxu1 }
 0x1de   : > { %835 = vmatpush3.bf16.xpose.msra.mxu0 %v591_v26  ;;  %v544_v45 = vadd.f32 %v736_v13, %v543_v44  ;;  %v827_v46 = vpop.f32.mrb[26].mxu1 }
 0x1df   : > { %v584_v47 = vmax.f32 %v552_v43, 0.0  ;;  %836 = vmatprep.subr.bf16.mxu0 %v976_v10  ;;  %v555_v48 = vadd.f32 %v827_v46, %v736_v13  ;;  %v546_v49 = vpop.f32.mrb[27].mxu1 }
 0x1e0   : > { %v582_v50 = vmax.f32 %v544_v45, 0.0  ;;  %v547_v51 = vadd.f32 %v736_v13, %v546_v49 }
 0x1e1   : > { %v585_v52 = vmax.f32 %v555_v48, 0.0 }
 0x1e2   : > { %v583_v53 = vmax.f32 %v547_v51, 0.0 }
 0x1e3   : > { %v595_v54 = vpack.c.bf16 %v585_v52, %v584_v47 }
 0x1e4   : > { %v594_v55 = vpack.c.bf16 %v583_v53, %v582_v50  ;;  %v830_v56 = vpop.f32.mrb[28].mxu1 }
 0x1e5   : > { %v568_v57 = vadd.f32 %v830_v56, %v736_v13  ;;  %v559_v58 = vpop.f32.mrb[29].mxu1 }
 0x1e6   : > { %837 = vmatpush3.bf16.xpose.msra.mxu0 %v592_v41  ;;  %v560_v59 = vadd.f32 %v736_v13, %v559_v58  ;;  %v831_v60 = vpop.f32.mrb[30].mxu1 }
 0x1e7   : > { %838 = vmatprep.subr.bf16.mxu0 %v976_v10  ;;  %v588_v61 = vmax.f32 %v568_v57, 0.0  ;;  %v571_v62 = vadd.f32 %v831_v60, %v736_v13  ;;  %v562_v63 = vpop.f32.mrb[31].mxu1 }
 0x1e8   : > { %v586_v0 = vmax.f32 %v560_v59, 0.0  ;;  %v563_v1 = vadd.f32 %v736_v13, %v562_v63 }
 0x1e9   : > { %v589_v2 = vmax.f32 %v571_v62, 0.0 }
 0x1ea   : > { %v587_v3 = vmax.f32 %v563_v1, 0.0 }
 0x1eb   : > { %v597_v4 = vpack.c.bf16 %v589_v2, %v588_v61 }
 0x1ec   : > { %v596_v5 = vpack.c.bf16 %v587_v3, %v586_v0 }
 0x1ee   : > { %839 = vmatpush3.bf16.xpose.msra.mxu0 %v593_v40 }
 0x1ef   : > { %840 = vmatprep.subr.bf16.mxu0 %v976_v10 }
 0x1f6   : > { %841 = vmatpush3.bf16.xpose.msra.mxu0 %v594_v55 }
 0x1f7   : > { %842 = vmatprep.subr.bf16.mxu0 %v976_v10 }
 0x1fe   : > { %843 = vmatpush3.bf16.xpose.msra.mxu0 %v595_v54 }
 0x1ff   : > { %844 = vmatprep.subr.bf16.mxu0 %v976_v10 }
 0x206   : > { %845 = vmatpush3.bf16.xpose.msra.mxu0 %v596_v5 }
 0x207   : > { %846 = vmatprep.subr.bf16.mxu0 %v976_v10 }
 0x20e   : > { %847 = vmatpush3.bf16.xpose.msra.mxu0 %v597_v4 }
 0x215   : > { %849 = vmatmul.mubr.bf16.vlgmr.msra.gmra.mrb[0].mxu0 %v225_v6 }
 0x2e8   : > { %v637_v8 = vpop.f32.mrb[0].mxu0 }
 0x2e9   : > { %v638_v9 = vadd.f32 %v637_v8, %v601_v7  ;;  %v850_v11 = vpop.f32.mrb[1].mxu0 }
 0x2ea   : > { %v640_v10 = vpop.f32.mrb[2].mxu0 }
 0x2eb   : > { %643 = vst [vmem:[%s175_s16] sm:$0x1] %v638_v9  ;;  %v851_v12 = vpop.f32.mrb[3].mxu0 }
 0x2ec   : > { %925 = shalt.err (!%p922_p3)
}
 0x2ed   : > { %s926_s26 = scalar_lea.hbm %s1123_s24, 16  ;;  %s930_s6 = scalar_lea.hbm %s1168_s3, 32 }
 0x2ee   : > { %p927_p4 = scmp.ne.s32.totalorder %s1123_s24, %s926_s26  ;;  %p931_p9 = scmp.lt.u32.totalorder %s1123_s24, %s1168_s3 }
 0x2ef   : > { %p932_p10 = scmp.lt.u32.totalorder %s930_s6, %s926_s26  ;;  %p934_p12 = scmp.lt.u32.totalorder %s926_s26, %s1123_s24 }
 0x2f0   : > { %p928_p7 = pnand %p927_p4, %p1035_p5 }
 0x2f1   : > { %p933_p11 = por %p932_p10, %p931_p9 }
 0x2f2   : > { %p929_p8 = pneg %p928_p7 }
 0x2f3   : > { %p935_p13 = por %p934_p12, %p933_p11 }
 0x2f5   : > { %p936_p0 = pnand %p935_p13, %p929_p8 }
 0x2f7   : > { %939 = shalt.err (!%p936_p0)
}
 0x2f8   : > { %852 = dma.vmem_to_hbm [thread:$0]  (%p1035_p5), %s1125_s17, 16, %s1123_s24, %s645_s25  }
 0x2f9 PF: > { %p858_p1 = scmp.ge.s32.totalorder %s974_s15, 2  ;;  %s669_s9 = sand.u32 1, %s962_s12  }
 0x2fa   : > { %s670_s10 = scalar_lea.sflag [#allocation3], %s669_s9 }
 0x2fb   : > { %p855_p2 = pnand %p858_p1, %p1039_p6 }
 0x2fd   : > { %957 = dma.done.wait (!%p855_p2), %s670_s10, 16  }
 0x2fe   : > { %959 = vsyncadd (!%p855_p2), %s670_s10, 4294967280  ;;  %p13_p3 = scmp.ge.s32.totalorder %s1023_s18, 4   ;;  %s1171_s12 = smov %s966_s13 }
 0x2ff   : > { %s1172_s13 = smov %s970_s14  ;;  %s1173_s14 = smov %s1033_s21 }
 0x300   : > { %s1174_s15 = smov %s1023_s18  ;;  %15 = sbr.rel (!%p13_p3) target bundleno = 3 (0x3), region = 67 }
 0x307   :  { %674 = vsyncpa [#allocation3], 1 }
 0x308   :  { %676 = vsyncpa [#allocation3 + $0x1], 1 }

</bundles_post_ra>
